<compile_context>
chip_gen: v6e
topology: v6e:2x2x1
jax: 0.10.0
libtpu: 0.0.40
codegen_flags: <defaults>
</compile_context>

<pallas_src>
import jax
import jax.numpy as jnp
from jax.experimental import pallas as pl
from jax.experimental.pallas import tpu as pltpu

# CartPole-like environment: obs dim 4, 2 actions
NUM_STATES = 4
NUM_ACTIONS = 2
HIDDEN1 = 50
HIDDEN2 = 30

LANES = 128      # lane width of the packed weight slab / hidden activations
IN_LANES = 8     # packed input width:  [x0..x3, 1.0, 0, 0, 0]
OUT_LANES = 8    # packed output width: [q0, q1, 0, ..., 0]

# Row layout of the single packed (128, 128) parameter slab (rows = contraction dim):
L0_ROWS = (0, 8)     # layer 1: consumes the 8 packed input lanes
L1_ROWS = (8, 64)    # layer 2: consumes h1 lanes 0..55 (50 units + carry-1 at lane 50)
L2_ROWS = (64, 96)   # layer 3: consumes h2 lanes 0..31 (30 units + carry-1 at lane 30)

MAX_ROWS_PER_TILE = 2048  # keep per-tile intermediates comfortably inside VMEM


def net_kernel(x_ref, p_ref, o_ref):
    # x_ref: (bm, 8)   packed input tile
    # p_ref: (128,128) packed/padded weights with bias rows + carry-1 columns
    # o_ref: (bm, 8)   Q-values in lanes [0,2), zeros elsewhere
    x = x_ref[...]
    w0 = p_ref[L0_ROWS[0]:L0_ROWS[1], :]   # (8, 128)
    w1 = p_ref[L1_ROWS[0]:L1_ROWS[1], :]   # (56, 128)
    w2 = p_ref[L2_ROWS[0]:L2_ROWS[1], :]   # (32, 128)

    h1 = jnp.maximum(jnp.dot(x, w0, preferred_element_type=jnp.float32), 0.0)
    h2 = jnp.maximum(
        jnp.dot(h1[:, : L1_ROWS[1] - L1_ROWS[0]], w1,
                preferred_element_type=jnp.float32), 0.0)
    q = jnp.dot(h2[:, : L2_ROWS[1] - L2_ROWS[0]], w2,
                preferred_element_type=jnp.float32)
    o_ref[...] = q[:, :OUT_LANES].astype(o_ref.dtype)


def pack_params(params):
    """Pack (w1,b1,w2,b2,w3,b3) into a single zero-padded (128, 128) f32 slab.

    Rows are the contraction dim of each layer's matmul:
      rows  0..3  : W1 (4x50)   | row  4 : b1, plus 1.0 at col 50 (bias carry)
      rows  8..57 : W2 (50x30)  | row 58 : b2, plus 1.0 at col 30 (bias carry)
      rows 64..93 : W3 (30x2)   | row 94 : b3
    All other entries are zero, so the zero-padded activation lanes contribute
    nothing and the result is exact in f32 (ReLU(1) == 1 keeps the carry alive).
    """
    w1, b1, w2, b2, w3, b3 = params
    slab = jnp.zeros((LANES, LANES), jnp.float32)
    # layer 1: input lanes -> HIDDEN1
    slab = slab.at[:NUM_STATES, :HIDDEN1].set(w1)
    slab = slab.at[NUM_STATES, :HIDDEN1].set(b1.reshape(-1))
    slab = slab.at[NUM_STATES, HIDDEN1].set(1.0)             # carry the constant 1
    # layer 2: h1 lanes 0..55 -> HIDDEN2
    r = L1_ROWS[0]
    slab = slab.at[r:r + HIDDEN1, :HIDDEN2].set(w2)
    slab = slab.at[r + HIDDEN1, :HIDDEN2].set(b2.reshape(-1))
    slab = slab.at[r + HIDDEN1, HIDDEN2].set(1.0)            # carry the constant 1
    # layer 3: h2 lanes 0..31 -> NUM_ACTIONS
    r = L2_ROWS[0]
    slab = slab.at[r:r + HIDDEN2, :NUM_ACTIONS].set(w3)
    slab = slab.at[r + HIDDEN2, :NUM_ACTIONS].set(b3.reshape(-1))
    return slab


def _pad_input(x, b_pad):
    """Pack x into an (b_pad, 8) slab: features in cols 0..3, constant 1.0 in col 4."""
    b = x.shape[0]
    xp = jnp.zeros((b_pad, IN_LANES), jnp.float32)
    xp = xp.at[:b, :NUM_STATES].set(x.astype(jnp.float32))
    xp = xp.at[:b, NUM_STATES].set(1.0)   # bias via the matmul's carry row
    return xp


def _num_tensorcores():
    # v7x has 2 TensorCores per chip; v5e/v6e have 1.  Fallback is 1 (always safe:
    # a 2nd grid step on a 1-TC chip would only add per-step overhead).
    try:
        kind = str(jax.devices()[0].device_kind).lower()
    except Exception:
        return 1
    return 2 if "v7" in kind else 1


def net_forward(x, slab):
    """x: (B, NUM_STATES) f32; slab: (128, 128) from pack_params. Returns (B, NUM_ACTIONS)."""
    b = x.shape[0]
    b_pad = max(8, pl.next_power_of_2(b))         # bucket batch sizes -> fewer recompiles
    n_tc = _num_tensorcores()
    # One grid step on 1-TC chips; exactly two parallel steps on v7x for big batches.
    grid_n = 2 if (n_tc >= 2 and b_pad >= 256) else 1
    while b_pad // grid_n > MAX_ROWS_PER_TILE:    # cap tile rows for VMEM headroom
        grid_n *= 2
    bm = b_pad // grid_n                          # power of two, multiple of 8

    xp = _pad_input(x, b_pad)
    out_padded = pl.pallas_call(
        net_kernel,
        out_shape=jax.ShapeDtypeStruct((b_pad, OUT_LANES), jnp.float32),
        grid=(grid_n,),
        in_specs=[
            # last dim (8) equals the full array dim, so the (8,128) rule is satisfied
            pl.BlockSpec((bm, IN_LANES), lambda i: (i, 0)),      # x tile
            pl.BlockSpec((LANES, LANES), lambda i: (0, 0)),      # params resident across steps
        ],
        out_specs=pl.BlockSpec((bm, OUT_LANES), lambda i: (i, 0)),
        compiler_params=pltpu.CompilerParams(
            dimension_semantics=("parallel",)),                  # 2-way megacore split on v7x
    )(xp, slab)
    return out_padded[:b, :NUM_ACTIONS]


net_forward_jit = jax.jit(net_forward)


def init_params(key):
    k1, k2, k3, k4, k5, k6 = jax.random.split(key, 6)
    # torch: weight.data.normal_(0, 0.1); stored here as (in, out)
    w1 = 0.1 * jax.random.normal(k1, (NUM_STATES, HIDDEN1), jnp.float32)
    w2 = 0.1 * jax.random.normal(k2, (HIDDEN1, HIDDEN2), jnp.float32)
    w3 = 0.1 * jax.random.normal(k3, (HIDDEN2, NUM_ACTIONS), jnp.float32)
    # torch default bias init: U(-1/sqrt(fan_in), 1/sqrt(fan_in))
    b1 = jax.random.uniform(k4, (1, HIDDEN1), jnp.float32,
                            -1.0 / NUM_STATES ** 0.5, 1.0 / NUM_STATES ** 0.5)
    b2 = jax.random.uniform(k5, (1, HIDDEN2), jnp.float32,
                            -1.0 / HIDDEN1 ** 0.5, 1.0 / HIDDEN1 ** 0.5)
    b3 = jax.random.uniform(k6, (1, NUM_ACTIONS), jnp.float32,
                            -1.0 / HIDDEN2 ** 0.5, 1.0 / HIDDEN2 ** 0.5)
    return (w1, b1, w2, b2, w3, b3)


def reference_forward(x, params):
    w1, b1, w2, b2, w3, b3 = params
    h1 = jnp.maximum(x @ w1 + b1, 0.0)
    h2 = jnp.maximum(h1 @ w2 + b2, 0.0)
    return h2 @ w3 + b3


if __name__ == "__main__":
    key = jax.random.PRNGKey(0)
    kp, kx, kx2 = jax.random.split(key, 3)
    params = init_params(kp)
    slab = pack_params(params)  # packed once; reused across calls (single 64 KiB DMA/call)

    # small inference-style batch (action selection)
    B = 8
    x = jax.random.normal(kx, (B, NUM_STATES), jnp.float32)
    out = jax.block_until_ready(net_forward_jit(x, slab))
    ref = reference_forward(x, params)
    assert out.shape == (B, NUM_ACTIONS)
    assert jnp.allclose(out, ref, atol=1e-4, rtol=1e-4)

    # training-style minibatch (exercises the 2-way parallel grid path on v7x,
    # single big tile on v5e/v6e)
    B2 = 256
    x2 = jax.random.normal(kx2, (B2, NUM_STATES), jnp.float32)
    out2 = jax.block_until_ready(net_forward_jit(x2, slab))
    ref2 = reference_forward(x2, params)
    assert out2.shape == (B2, NUM_ACTIONS)
    assert jnp.allclose(out2, ref2, atol=1e-4, rtol=1e-4)

    print("KERNEL_OK")
</pallas_src>

<mosaic_0001>
module attributes {stable_mosaic.version = 11 : i64} {
  func.func @net_kernel(%arg0: i32, %arg1: memref<8x8xf32, #tpu.memory_space<vmem>>, %arg2: memref<128x128xf32, #tpu.memory_space<vmem>>, %arg3: memref<8x8xf32, #tpu.memory_space<vmem>>) attributes {dimension_semantics = [#tpu.dimension_semantics<parallel>], iteration_bounds = array<i64: 1>, scalar_prefetch = 0 : i64, scratch_operands = 0 : i64, tpu.core_type = #tpu.core_type<tc>, window_params = [{transform_indices = @transform_0, window_bounds = array<i64: 8, 8>}, {pipeline_mode = #tpu.pipeline_mode<synchronous>, transform_indices = @transform_1, window_bounds = array<i64: 128, 128>}, {transform_indices = @transform_2, window_bounds = array<i64: 8, 8>}]} {
    %c0 = arith.constant 0 : index
    %c0_0 = arith.constant 0 : index
    %0 = vector.load %arg1[%c0, %c0_0] : memref<8x8xf32, #tpu.memory_space<vmem>>, vector<8x8xf32>
    %c0_1 = arith.constant 0 : index
    %c0_2 = arith.constant 0 : index
    %1 = vector.load %arg2[%c0_1, %c0_2] : memref<128x128xf32, #tpu.memory_space<vmem>>, vector<8x128xf32>
    %c8 = arith.constant 8 : index
    %c0_3 = arith.constant 0 : index
    %2 = vector.load %arg2[%c8, %c0_3] : memref<128x128xf32, #tpu.memory_space<vmem>>, vector<56x128xf32>
    %c64 = arith.constant 64 : index
    %c0_4 = arith.constant 0 : index
    %3 = vector.load %arg2[%c64, %c0_4] : memref<128x128xf32, #tpu.memory_space<vmem>>, vector<32x128xf32>
    %cst = arith.constant dense<0.000000e+00> : vector<8x128xf32>
    %4 = tpu.matmul %0, %1, %cst {dimension_numbers = #tpu.dot_dimension_numbers<[1], [0], [0], [1], [0, 0, 1, 1], [], []>} : vector<8x8xf32>, vector<8x128xf32>, vector<8x128xf32> -> vector<8x128xf32>
    %cst_5 = arith.constant 0.000000e+00 : f32
    %5 = vector.broadcast %cst_5 : f32 to vector<8x128xf32>
    %6 = arith.maximumf %4, %5 : vector<8x128xf32>
    %7 = vector.extract_strided_slice %6 {offsets = [0, 0], sizes = [8, 56], strides = [1, 1]} : vector<8x128xf32> to vector<8x56xf32>
    %cst_6 = arith.constant dense<0.000000e+00> : vector<8x128xf32>
    %8 = tpu.matmul %7, %2, %cst_6 {dimension_numbers = #tpu.dot_dimension_numbers<[1], [0], [0], [1], [0, 0, 1, 1], [], []>} : vector<8x56xf32>, vector<56x128xf32>, vector<8x128xf32> -> vector<8x128xf32>
    %cst_7 = arith.constant 0.000000e+00 : f32
    %9 = vector.broadcast %cst_7 : f32 to vector<8x128xf32>
    %10 = arith.maximumf %8, %9 : vector<8x128xf32>
    %11 = vector.extract_strided_slice %10 {offsets = [0, 0], sizes = [8, 32], strides = [1, 1]} : vector<8x128xf32> to vector<8x32xf32>
    %cst_8 = arith.constant dense<0.000000e+00> : vector<8x128xf32>
    %12 = tpu.matmul %11, %3, %cst_8 {dimension_numbers = #tpu.dot_dimension_numbers<[1], [0], [0], [1], [0, 0, 1, 1], [], []>} : vector<8x32xf32>, vector<32x128xf32>, vector<8x128xf32> -> vector<8x128xf32>
    %13 = vector.extract_strided_slice %12 {offsets = [0, 0], sizes = [8, 8], strides = [1, 1]} : vector<8x128xf32> to vector<8x8xf32>
    %c0_9 = arith.constant 0 : index
    %c0_10 = arith.constant 0 : index
    %14 = vector.load %arg3[%c0_9, %c0_10] : memref<8x8xf32, #tpu.memory_space<vmem>>, vector<8x8xf32>
    tpu.vector_store %arg3[%c0_9, %c0_10], %13 {strides = array<i32>} : memref<8x8xf32, #tpu.memory_space<vmem>>, vector<8x8xf32>,
    return
  }
  func.func @transform_0(%arg0: i32) -> (i32, i32) {
    %c0_i32 = arith.constant 0 : i32
    %c0_i32_0 = arith.constant 0 : i32
    return %arg0, %c0_i32 : i32, i32
  }
  func.func @transform_1(%arg0: i32) -> (i32, i32) {
    %c0_i32 = arith.constant 0 : i32
    %c0_i32_0 = arith.constant 0 : i32
    %c0_i32_1 = arith.constant 0 : i32
    return %c0_i32, %c0_i32_0 : i32, i32
  }
  func.func @transform_2(%arg0: i32) -> (i32, i32) {
    %c0_i32 = arith.constant 0 : i32
    %c0_i32_0 = arith.constant 0 : i32
    return %arg0, %c0_i32 : i32, i32
  }
}

</mosaic_0001>

<bundles_post_ra>
// kernel: net_forward.1
= control target key start
LH: loop header
LB: loop body
LE: loop exit
PB: predicated region body
PF: predicated region fallthrough
CT: control target
= control target key end

     0   :  { %7 = vsyncpa [#allocation3], 0  ;;  %s346_s9 = smov [#allocation2]   ;;  %s380_s0 = inlined_call_operand.vmem [shape: f32[8,8], index: 0, kind: input, shape index: {}]   ;;  %s381_s1 = inlined_call_operand.hbm [shape: f32[128,128], index: 1, kind: input, shape index: {}]   ;;  %s382_s2 = inlined_call_operand.vmem [shape: f32[8,8], index: 2, kind: output, shape index: {}]  }
   0x1   :  { %s15_s10 = sshll.u32 %s346_s9, 4  ;;  %s16_s10 = int_to_ptr.vmem [resolvable:$true] %s15_s10 }
   0x2   :  { %s332_s11 = scalar_lea.vmem %s16_s10, 2048  ;;  %p337_p1 = scmp.lt.s32.totalorder %s16_s10, %s16_s10 }
   0x3   :  { %p333_p0 = scmp.ne.s32.totalorder %s16_s10, %s332_s11  ;;  %p338_p2 = scmp.lt.s32.totalorder %s332_s11, %s332_s11 }
   0x5   :  { %p339_p3 = por %p338_p2, %p337_p1 }
   0x7   :  { %p340_p4 = pnand %p339_p3, %p333_p0 }
   0x9   :  { %343 = shalt.err (!%p340_p4)
}
   0xa   :  { %s347_s12 = smov 128   ;;  %s348_s13 = smov 8  }
   0xb   :  { %21 = dma.hbm_to_vmem [thread:$0]  %s381_s1, 2048, %s16_s10, [#allocation3], %s347_s12, %s347_s12, %s348_s13  }
   0xc   :  { %344 = dma.done.wait [#allocation3], 2048  }
   0xd   :  { %345 = vsyncadd [#allocation3], 4294965248  ;;  %v349_v0 = vmov 0.0   ;;  %vm350_vm0 = vmmov 0   ;;  %vm38_vm1 = vcmask 64512   ;;  %v26_v1 = vld [vmem:[#allocation2] sm:$0xff] }
   0xe   :  { %286 = vmatprep.subr.mxu0 %v349_v0  ;;  %288 = vmatprep.mubr.msk.f32.mxu0 %vm350_vm0, %v349_v0  ;;  %v25_v2 = vld [vmem:[%s380_s0] sm:$0xff]  ;;  %v33_v3 = vld [vmem:[#allocation2 + $0x38] sm:$0xff]  ;;  %v32_v4 = vld [vmem:[#allocation2 + $0x30] sm:$0xff]  ;;  %vm113_vm2 = vcmask 457728   ;;  %vm188_vm3 = vcmask 261120  }
   0xf   :  { %291 = vmatprep.subr.mxu1 %v349_v0  ;;  %305 = vmatprep.mubr.msk.f32.mxu1 %vm350_vm0, %v349_v0  ;;  %v31_v5 = vld [vmem:[#allocation2 + $0x28] sm:$0xff]  ;;  %v30_v6 = vld [vmem:[#allocation2 + $0x20] sm:$0xff]  ;;  %v29_v7 = vld [vmem:[#allocation2 + $0x18] sm:$0xff] }
  0x10   :  { %287 = vmatpush3.msra.mxu0 %v26_v1  ;;  %292 = vmatpush3.msra.mxu1 %v33_v3  ;;  %v28_v8 = vld [vmem:[#allocation2 + $0x10] sm:$0xff]  ;;  %v27_v9 = vld [vmem:[#allocation2 + $0x8] sm:$0xff]  ;;  %v37_v10 = vld [vmem:[#allocation2 + $0x58] sm:$0xff] }
  0x11   :  { %289 = vmatmul.mubr.msk.f32.vlgmr.msra.gmra.mxu0 %vm38_vm1, %v25_v2  ;;  %293 = vmatprep.subr.mxu1 %v349_v0  ;;  %v36_v11 = vld [vmem:[#allocation2 + $0x50] sm:$0xff]  ;;  %v35_v15 = vld [vmem:[#allocation2 + $0x48] sm:$0xff]  ;;  %v34_v16 = vld [vmem:[#allocation2 + $0x40] sm:$0xff] }
  0x12   :  { %294 = vmatpush3.msra.mxu1 %v32_v4  ;;  %308 = vmatprep.subr.mxu0 %v349_v0 }
  0x13   :  { %295 = vmatprep.subr.mxu1 %v349_v0  ;;  %316 = vmatprep.mubr.msk.f32.mxu0 %vm350_vm0, %v349_v0 }
  0x14   :  { %296 = vmatpush3.msra.mxu1 %v31_v5  ;;  %309 = vmatpush3.msra.mxu0 %v37_v10 }
  0x15   :  { %297 = vmatprep.subr.mxu1 %v349_v0  ;;  %310 = vmatprep.subr.mxu0 %v349_v0 }
  0x16   :  { %298 = vmatpush3.msra.mxu1 %v30_v6  ;;  %311 = vmatpush3.msra.mxu0 %v36_v11 }
  0x17   :  { %299 = vmatprep.subr.mxu1 %v349_v0  ;;  %312 = vmatprep.subr.mxu0 %v349_v0 }
  0x18   :  { %300 = vmatpush3.msra.mxu1 %v29_v7  ;;  %313 = vmatpush3.msra.mxu0 %v35_v15 }
  0x19   :  { %301 = vmatprep.subr.mxu1 %v349_v0  ;;  %314 = vmatprep.subr.mxu0 %v349_v0 }
  0x1a   :  { %302 = vmatpush3.msra.mxu1 %v28_v8  ;;  %315 = vmatpush3.msra.mxu0 %v34_v16 }
  0x1b   :  { %303 = vmatprep.subr.mxu1 %v349_v0 }
  0x1c   :  { %304 = vmatpush3.msra.mxu1 %v27_v9 }
  0xd1   :  { %v108_v12 = vpop.f32.mrf.mxu0 }
  0xd2   :  { %v112_v13 = vmax.f32 %v108_v12, 0.0 }
  0xd3   :  { %v290_v14 = vpop.f32.mrf.mxu0 }
  0xd4   :  { %306 = vmatmul.mubr.msk.f32.vlgmr.msra.gmra.mxu1 %vm113_vm2, %v112_v13 }
 0x194   :  { %v183_v17 = vpop.f32.mrf.mxu1 }
 0x195   :  { %v187_v18 = vmax.f32 %v183_v17, 0.0 }
 0x196   :  { %v307_v19 = vpop.f32.mrf.mxu1 }
 0x197   :  { %317 = vmatmul.mubr.msk.f32.vlgmr.msra.gmra.mxu0 %vm188_vm3, %v187_v18 }
 0x257   :  { %v258_v20 = vpop.f32.mrf.mxu0 }
 0x258   :  { %262 = vst.msk [vmem:[%s382_s2] sm:$0xff] %vm38_vm1, %v258_v20 }
 0x259   :  { %v318_v21 = vpop.f32.mrf.mxu0 }
 0x25a   :  { %267 = vsyncpa [#allocation3], 1 }

</bundles_post_ra>
